<compile_context>
chip_gen: v5e
topology: v5e:2x2
jax: 0.10.0
libtpu: 0.0.40
codegen_flags: <defaults>
</compile_context>

<pallas_src>
import jax
import jax.numpy as jnp
from jax.experimental import pallas as pl
from jax.experimental.pallas import tpu as pltpu

_PREF_LANES = 1024                     # preferred lane width (multiple of 128)
_MAX_LANES = 8192                      # cap for the divisor search
_TARGET_TILE_BYTES = 6 * 1024 * 1024   # ~6 MiB per buffer -> ~24 MiB double-buffered
_VMEM_LIMIT_BYTES = 40 * 1024 * 1024   # headroom on v7x (64 MiB phys), fine on v5e/v6e


def _to_var_kernel(x_ref, o_ref):
    z = x_ref[...] + 0.5
    # Numerically stable softplus: max(z, 0) + log(1 + exp(-|z|)).
    # t = exp(-|z|) in (0, 1]; plain log(1 + t) is cheaper than log1p and only
    # loses accuracy when t < ~6e-8, where max(z, 0) >= 16 dominates the sum.
    t = jnp.exp(-jnp.abs(z))
    sp = jnp.maximum(z, 0.0) + jnp.log(1.0 + t)
    sigma = sp + 1e-08
    o_ref[...] = sigma * sigma


def _round_up(a, b):
    return (a + b - 1) // b * b


def _choose_lanes(numel):
    """Largest 'nice' multiple of 128 that divides numel; 0 if none exists."""
    if numel % _PREF_LANES == 0:
        return _PREF_LANES
    best = 0
    lanes = 128
    while lanes <= min(_MAX_LANES, numel):
        if numel % lanes == 0:
            best = lanes
        lanes += 128
    return best


@jax.jit
def to_var(x):
    """Elementwise (softplus(x + 0.5) + 1e-8) ** 2 over any-shaped tensor."""
    orig_shape = x.shape
    numel = x.size
    itemsize = jnp.dtype(x.dtype).itemsize

    lanes = _choose_lanes(numel)
    padded = numel
    if lanes == 0:
        # TODO(synk): element counts that are not a multiple of 128 still take
        # one pad + slice pass (fused under jit); a ragged 1-D grid would avoid it.
        lanes = _PREF_LANES
        padded = _round_up(numel, lanes)

    flat = x.reshape(-1)
    if padded != numel:
        flat = jnp.pad(flat, (0, padded - numel))
    rows = padded // lanes
    x2d = flat.reshape(rows, lanes)

    # Sublane granule: 8 for 4-byte dtypes, 16 for 2-byte (packed) dtypes.
    sub = 8 if itemsize >= 4 else 16

    # Row tile: big enough to amortize per-step overhead, small enough for VMEM,
    # and split into >= 2 blocks when possible so v7x's second TC gets work.
    cap_rows = max(sub, (_TARGET_TILE_BYTES // (lanes * itemsize)) // sub * sub)
    if rows > sub:
        tile_rows = min(rows, cap_rows, _round_up(pl.cdiv(rows, 2), sub))
    else:
        tile_rows = rows  # full extent (always legal)
    grid = (pl.cdiv(rows, tile_rows),)

    cost = pl.CostEstimate(
        flops=7 * padded,                       # add, abs/neg, add, max, add, add, mul
        transcendentals=2 * padded,             # exp, log
        bytes_accessed=2 * padded * itemsize,   # one read + one write of the slab
    )

    out2d = pl.pallas_call(
        _to_var_kernel,
        out_shape=jax.ShapeDtypeStruct((rows, lanes), x2d.dtype),
        grid=grid,
        in_specs=[pl.BlockSpec((tile_rows, lanes), lambda i: (i, 0))],
        out_specs=pl.BlockSpec((tile_rows, lanes), lambda i: (i, 0)),
        compiler_params=pltpu.CompilerParams(
            dimension_semantics=("parallel",),
            vmem_limit_bytes=_VMEM_LIMIT_BYTES,
        ),
        cost_estimate=cost,
    )(x2d)

    out_flat = out2d.reshape(-1)
    if padded != numel:
        out_flat = out_flat[:numel]
    return out_flat.reshape(orig_shape)


if __name__ == "__main__":
    key = jax.random.PRNGKey(0)
    x = jax.random.normal(key, (2, 4, 16, 16), dtype=jnp.float32)

    y = to_var(x)
    jax.block_until_ready(y)

    # Sanity check against a pure-JAX reference (matches the PyTorch module).
    ref = (jax.nn.softplus(x + 0.5) + 1e-08) ** 2
    assert y.shape == x.shape
    assert jnp.allclose(y, ref, atol=1e-6, rtol=1e-6)

    print("KERNEL_OK")
</pallas_src>

<mosaic_0001>
module attributes {stable_mosaic.version = 11 : i64} {
  func.func @_to_var_kernel(%arg0: i32, %arg1: memref<2x1024xf32, #tpu.memory_space<vmem>>, %arg2: memref<2x1024xf32, #tpu.memory_space<vmem>>) attributes {dimension_semantics = [#tpu.dimension_semantics<parallel>], iteration_bounds = array<i64: 1>, scalar_prefetch = 0 : i64, scratch_operands = 0 : i64, tpu.core_type = #tpu.core_type<tc>, window_params = [{transform_indices = @transform_0, window_bounds = array<i64: 2, 1024>}, {transform_indices = @transform_1, window_bounds = array<i64: 2, 1024>}]} {
    %c0 = arith.constant 0 : index
    %c0_0 = arith.constant 0 : index
    %0 = vector.load %arg1[%c0, %c0_0] : memref<2x1024xf32, #tpu.memory_space<vmem>>, vector<2x1024xf32>
    %cst = arith.constant 5.000000e-01 : f32
    %1 = vector.broadcast %cst : f32 to vector<2x1024xf32>
    %2 = arith.addf %0, %1 : vector<2x1024xf32>
    %3 = math.absf %2 : vector<2x1024xf32>
    %cst_1 = arith.constant 0.000000e+00 : f32
    %4 = vector.broadcast %cst_1 : f32 to vector<2x1024xf32>
    %5 = arith.subf %4, %3 : vector<2x1024xf32>
    %6 = math.exp %5 : vector<2x1024xf32>
    %cst_2 = arith.constant 0.000000e+00 : f32
    %7 = vector.broadcast %cst_2 : f32 to vector<2x1024xf32>
    %8 = arith.maximumf %2, %7 : vector<2x1024xf32>
    %cst_3 = arith.constant 1.000000e+00 : f32
    %9 = vector.broadcast %cst_3 : f32 to vector<2x1024xf32>
    %10 = arith.addf %9, %6 : vector<2x1024xf32>
    %11 = math.log %10 : vector<2x1024xf32>
    %12 = arith.addf %8, %11 : vector<2x1024xf32>
    %cst_4 = arith.constant 9.99999993E-9 : f32
    %13 = vector.broadcast %cst_4 : f32 to vector<2x1024xf32>
    %14 = arith.addf %12, %13 : vector<2x1024xf32>
    %15 = arith.mulf %14, %14 : vector<2x1024xf32>
    %c0_5 = arith.constant 0 : index
    %c0_6 = arith.constant 0 : index
    %16 = vector.load %arg2[%c0_5, %c0_6] : memref<2x1024xf32, #tpu.memory_space<vmem>>, vector<2x1024xf32>
    tpu.vector_store %arg2[%c0_5, %c0_6], %15 {strides = array<i32>} : memref<2x1024xf32, #tpu.memory_space<vmem>>, vector<2x1024xf32>,
    return
  }
  func.func @transform_0(%arg0: i32) -> (i32, i32) {
    %c0_i32 = arith.constant 0 : i32
    %c0_i32_0 = arith.constant 0 : i32
    return %arg0, %c0_i32 : i32, i32
  }
  func.func @transform_1(%arg0: i32) -> (i32, i32) {
    %c0_i32 = arith.constant 0 : i32
    %c0_i32_0 = arith.constant 0 : i32
    return %arg0, %c0_i32 : i32, i32
  }
}

</mosaic_0001>

<bundles_post_ra>
// kernel: to_var.1
= control target key start
LH: loop header
LB: loop body
LE: loop exit
PB: predicated region body
PF: predicated region fallthrough
CT: control target
= control target key end

     0   :  { %s70_s0 = inlined_call_operand.vmem [shape: f32[2,1024], index: 0, kind: input, shape index: {}]   ;;  %s71_s1 = inlined_call_operand.vmem [shape: f32[2,1024], index: 1, kind: output, shape index: {}]  }
   0x1   :  { %v8_v0 = vld [vmem:[%s70_s0] sm:$0xff]  ;;  %v9_v1 = vld [vmem:[%s70_s0 + $0x8] sm:$0xff] }
   0x2   :  { %v10_v2 = vadd.f32 0.5, %v8_v0  ;;  %v11_v3 = vadd.f32 0.5, %v9_v1 }
   0x4   :  { %v12_v4 = vand.u32 2147483647, %v10_v2  ;;  %v13_v5 = vand.u32 2147483647, %v11_v3  ;;  %v20_v14 = vmax.f32 %v10_v2, 0.0  ;;  %v21_v16 = vmax.f32 %v11_v3, 0.0 }
   0x6   :  { %v14_v6 = vsub.f32 0.0, %v12_v4  ;;  %v15_v7 = vsub.f32 0.0, %v13_v5 }
   0x8   :  { %v16_v8 = vmul.f32 1.442695, %v14_v6  ;;  %v18_v9 = vmul.f32 1.442695, %v15_v7 }
   0xa   :  { %40 = vpow2.f32 %v16_v8 }
   0xb   :  { %42 = vpow2.f32 %v18_v9 }
  0x10   :  { %v41_v10 = vpop.eup %40 }
  0x11   :  { %v43_v11 = vpop.eup %42  ;;  %v22_v12 = vadd.f32 1.0, %v41_v10 }
  0x12   :  { %v23_v13 = vadd.f32 1.0, %v43_v11 }
  0x13   :  { %44 = vlog2.f32 %v22_v12 }
  0x14   :  { %46 = vlog2.f32 %v23_v13 }
  0x19   :  { %v45_v15 = vpop.eup %44 }
  0x1a   :  { %v47_v17 = vpop.eup %46  ;;  %v25_v18 = vmul.f32 0.6931472, %v45_v15 }
  0x1b   :  { %v27_v19 = vmul.f32 0.6931472, %v47_v17 }
  0x1c   :  { %v28_v20 = vadd.f32 %v25_v18, %v20_v14 }
  0x1d   :  { %v29_v21 = vadd.f32 %v27_v19, %v21_v16 }
  0x1e   :  { %v30_v22 = vadd.f32 1e-08, %v28_v20 }
  0x1f   :  { %v31_v23 = vadd.f32 1e-08, %v29_v21 }
  0x20   :  { %v32_v24 = vmul.f32 %v30_v22, %v30_v22 }
  0x21   :  { %v33_v25 = vmul.f32 %v31_v23, %v31_v23 }
  0x22   :  { %34 = vst [vmem:[%s71_s1] sm:$0xff] %v32_v24 }
  0x23   :  { %35 = vst [vmem:[%s71_s1 + $0x8] sm:$0xff] %v33_v25 }

</bundles_post_ra>
